<compile_context>
chip_gen: v7x
topology: tpu7x:2x2x1
jax: 0.10.0
libtpu: 0.0.40
codegen_flags: <defaults>
</compile_context>

<pallas_src>
import math
import functools

import jax
import jax.numpy as jnp
from jax.experimental import pallas as pl
from jax.experimental.pallas import tpu as pltpu


# ------------------------------ small helpers --------------------------------

def _round_up(n, m):
    return ((n + m - 1) // m) * m


def _layer_norm(v, gamma, beta, eps=1e-5):
    mu = jnp.mean(v, axis=-1, keepdims=True)
    var = jnp.mean((v - mu) ** 2, axis=-1, keepdims=True)
    return (v - mu) * jax.lax.rsqrt(var + eps) * gamma + beta


def _const_spec(shape):
    """BlockSpec for an operand whose block index never changes across the grid.

    Single-buffered (pl.Buffered(1)): double-buffering a constant block is pure
    VMEM waste."""
    nd = len(shape)
    idx = lambda b, s, _n=nd: (0,) * _n
    try:
        return pl.BlockSpec(shape, idx, pipeline_mode=pl.Buffered(1))
    except (TypeError, ValueError):          # older jax without pipeline_mode
        return pl.BlockSpec(shape, idx)


def _hw_config():
    """Generation-aware (VMEM capacity, query-tile target)."""
    vmem_cap = 64 << 20
    try:
        vmem_cap = int(pltpu.get_tpu_info().vmem_capacity_bytes)
    except Exception:
        pass
    kind = ""
    try:
        kind = jax.devices()[0].device_kind.lower()
    except Exception:
        pass
    # v6e: 128 MiB VMEM + 256-wide MXU -> 256-row query tiles.
    # v5e: 128-wide MXU -> TQ=128.  v7x: only 64 MiB VMEM -> TQ=128.
    big_vmem = vmem_cap >= (96 << 20)
    old_mxu = any(t in kind for t in ("v2", "v3", "v4", "v5"))
    tq_target = 256 if (big_vmem and not old_mxu) else 128
    return vmem_cap, tq_target


def _vmem_limit(est_bytes, vmem_cap):
    cap = max(32 << 20, vmem_cap - (16 << 20))   # leave compiler-scratch headroom
    return int(min(max(est_bytes, 32 << 20), cap))


def _prepass_vmem(TQ, E):
    weights = 3 * E * E * 2 + 5 * E * 4                     # wqkv (single-buffered) + smalls
    io = 2 * TQ * E * 4 + 6 * TQ * E * 2                    # x in + q/k/v out (2-buffered)
    live = 24 * TQ * E
    return int(1.25 * (weights + io + live)) + (2 << 20)


def _main_vmem(S_pad, TQ, E, F_pad, H, ffn_chunk):
    weights = (E * E + 2 * E * F_pad) * 2 + (5 * E + F_pad) * 4   # single-buffered consts
    kv = 2 * 2 * S_pad * E * 2                                    # K + V inputs (2-buffered)
    tiles = 2 * (2 * TQ * E * 4 + TQ * E * 2)                     # x/out f32 + q bf16 tiles
    live = 2 * H * TQ * TQ * 4 + TQ * ffn_chunk * 4 + 12 * TQ * E * 4
    return int(1.25 * (weights + kv + tiles + live)) + (4 << 20)


def _pick_ffn_chunk(F_pad, TQ, target):
    if target is None:
        # keep the (TQ, chunk) f32 intermediate small, otherwise chunk at 2048
        target = F_pad if TQ * F_pad * 4 <= (2 << 20) else 2048
    target = max(target, min(F_pad, 128))
    c = min(F_pad, target)
    while F_pad % c:
        c -= 1
    return c


# ------------------------------ kernels ---------------------------------------

def qkv_projection_kernel(x_ref, g1_ref, b1_ref, wqkv_ref, bqkv_ref,
                          q_ref, k_ref, v_ref, *, num_heads):
    """LN1 + fused QKV projection for one (batch, sequence-tile)."""
    H = num_heads
    T, E = x_ref.shape[1], x_ref.shape[2]
    Dh = E // H

    xn = _layer_norm(x_ref[0], g1_ref[...], b1_ref[...])            # (T, E) f32
    qkv = jnp.dot(xn.astype(jnp.bfloat16), wqkv_ref[...],
                  preferred_element_type=jnp.float32) + bqkv_ref[...]   # (T, 3E) f32
    q = qkv[:, :E]
    k = qkv[:, E:2 * E]
    v = qkv[:, 2 * E:]
    # Heads batched: Q/V -> (H, T, Dh); K -> (H, Dh, T) so QK^T keeps keys lane-dense.
    q_ref[0, 0] = pltpu.einshape("shd->hsd", q.reshape(T, H, Dh)).astype(jnp.bfloat16)
    v_ref[0, 0] = pltpu.einshape("shd->hsd", v.reshape(T, H, Dh)).astype(jnp.bfloat16)
    k_ref[0, 0] = jnp.transpose(k).reshape(H, Dh, T).astype(jnp.bfloat16)


def encoder_layer_kernel(x_ref, q_ref, k_ref, v_ref,
                         wo_ref, bo_ref, g2_ref, b2_ref,
                         w1_ref, bb1_ref, w2_ref, bb2_ref,
                         out_ref,
                         *, num_heads, seq_len, ffn_chunk, unroll_kv):
    H = num_heads
    TQ, E = x_ref.shape[1], x_ref.shape[2]
    Dh = E // H
    n_kv = k_ref.shape[1]
    S_pad = n_kv * TQ
    F_pad = w1_ref.shape[1]

    x = x_ref[0]                    # (TQ, E) f32 residual stream
    q = q_ref[0, 0]                 # (H, TQ, Dh) bf16; 1/sqrt(Dh) already folded into Wq

    need_mask = seq_len < S_pad     # static (padded-sequence) flag

    # ---- attention: heads batched, online softmax over KV chunks of size TQ ----
    def kv_step(ci, carry):
        m, l, acc = carry
        kb = k_ref[0, ci]           # (H, Dh, TQ) bf16   (leading-dim chunk index)
        vb = v_ref[0, ci]           # (H, TQ, Dh) bf16
        s = jnp.einsum("hqd,hdk->hqk", q, kb,
                       preferred_element_type=jnp.float32)           # (H, TQ, TK) f32
        if need_mask:
            key_idx = ci * TQ + jax.lax.broadcasted_iota(jnp.int32, (1, 1, TQ), 2)
            s = jnp.where(key_idx < seq_len, s, -1e30)
        m_new = jnp.maximum(m, jnp.max(s, axis=-1, keepdims=True))
        alpha = jnp.exp(m - m_new)
        p = jnp.exp(s - m_new)
        l_new = alpha * l + jnp.sum(p, axis=-1, keepdims=True)
        acc_new = alpha * acc + jnp.einsum("hqk,hkd->hqd",
                                           p.astype(jnp.bfloat16), vb,
                                           preferred_element_type=jnp.float32)
        return m_new, l_new, acc_new

    carry0 = (jnp.full((H, TQ, 1), -1e30, jnp.float32),
              jnp.zeros((H, TQ, 1), jnp.float32),
              jnp.zeros((H, TQ, Dh), jnp.float32))
    if unroll_kv:                   # short trip count: static unroll
        carry = carry0
        for ci in range(n_kv):
            carry = kv_step(ci, carry)
        m, l, acc = carry
    else:                           # long sequences: bound live ranges with fori_loop
        m, l, acc = jax.lax.fori_loop(0, n_kv, kv_step, carry0)

    attn = acc * pl.reciprocal(l, approx=True)                       # (H, TQ, Dh) f32
    attn = pltpu.einshape("hqd->qhd", attn).reshape(TQ, E)
    attn = jnp.dot(attn.astype(jnp.bfloat16), wo_ref[...],
                   preferred_element_type=jnp.float32) + bo_ref[...]
    # TODO(synk): dropout omitted (eval-mode identity); no RNG masking applied.
    x1 = x + attn                                                    # residual 1 (f32)

    # ---- LayerNorm 2 + FFN (static short loop over F chunks) ----
    xn2 = _layer_norm(x1, g2_ref[...], b2_ref[...])
    xn2_b = xn2.astype(jnp.bfloat16)
    ffn = jnp.zeros((TQ, E), jnp.float32)
    for f0 in range(0, F_pad, ffn_chunk):
        h1 = jnp.dot(xn2_b, w1_ref[:, f0:f0 + ffn_chunk],
                     preferred_element_type=jnp.float32) + bb1_ref[:, f0:f0 + ffn_chunk]
        h1 = jnp.maximum(h1, 0.0)                                    # ReLU (f32)
        ffn = ffn + jnp.dot(h1.astype(jnp.bfloat16), w2_ref[f0:f0 + ffn_chunk, :],
                            preferred_element_type=jnp.float32)
    ffn = ffn + bb2_ref[...]

    out_ref[0] = (x1 + ffn).astype(out_ref.dtype)                    # residual 2


# ------------------------------ wrappers --------------------------------------

def _encoder_layer(x_pad, kp, num_heads, *, seq_len, TQ, vmem_cap, ffn_chunk_target):
    B, S_pad, E = x_pad.shape
    H = num_heads
    Dh = E // H
    F_pad = kp["w1"].shape[1]
    n_t = S_pad // TQ

    # ---- pre-pass: LN1 + fused QKV projection (hoisted out of the main kernel) ----
    q, k, v = pl.pallas_call(
        functools.partial(qkv_projection_kernel, num_heads=H),
        out_shape=(
            jax.ShapeDtypeStruct((B, n_t, H, TQ, Dh), jnp.bfloat16),   # Q (scale folded)
            jax.ShapeDtypeStruct((B, n_t, H, Dh, TQ), jnp.bfloat16),   # K (keys lane-dense)
            jax.ShapeDtypeStruct((B, n_t, H, TQ, Dh), jnp.bfloat16),   # V
        ),
        grid_spec=pltpu.PrefetchScalarGridSpec(
            num_scalar_prefetch=0,
            grid=(B, n_t),
            in_specs=[
                pl.BlockSpec((1, TQ, E), lambda b, s: (b, s, 0)),
                _const_spec((1, E)), _const_spec((1, E)),               # g1, b1
                _const_spec((E, 3 * E)), _const_spec((1, 3 * E)),       # wqkv, bqkv
            ],
            out_specs=(
                pl.BlockSpec((1, 1, H, TQ, Dh), lambda b, s: (b, s, 0, 0, 0)),
                pl.BlockSpec((1, 1, H, Dh, TQ), lambda b, s: (b, s, 0, 0, 0)),
                pl.BlockSpec((1, 1, H, TQ, Dh), lambda b, s: (b, s, 0, 0, 0)),
            ),
        ),
        compiler_params=pltpu.CompilerParams(
            dimension_semantics=("parallel", "parallel"),
            vmem_limit_bytes=_vmem_limit(_prepass_vmem(TQ, E), vmem_cap),
        ),
    )(x_pad, kp["g1"], kp["b1"], kp["wqkv"], kp["bqkv"])

    ffn_chunk = _pick_ffn_chunk(F_pad, TQ, ffn_chunk_target)
    unroll_kv = n_t <= 4

    kernel = functools.partial(
        encoder_layer_kernel, num_heads=H, seq_len=seq_len,
        ffn_chunk=ffn_chunk, unroll_kv=unroll_kv)

    return pl.pallas_call(
        kernel,
        out_shape=jax.ShapeDtypeStruct((B, S_pad, E), x_pad.dtype),
        grid_spec=pltpu.PrefetchScalarGridSpec(
            num_scalar_prefetch=0,
            grid=(B, n_t),
            in_specs=[
                pl.BlockSpec((1, TQ, E), lambda b, qi: (b, qi, 0)),               # x tile
                pl.BlockSpec((1, 1, H, TQ, Dh), lambda b, qi: (b, qi, 0, 0, 0)),  # q tile
                pl.BlockSpec((1, n_t, H, Dh, TQ), lambda b, qi: (b, 0, 0, 0, 0)), # K (full)
                pl.BlockSpec((1, n_t, H, TQ, Dh), lambda b, qi: (b, 0, 0, 0, 0)), # V (full)
                _const_spec((E, E)), _const_spec((1, E)),                          # wo, bo
                _const_spec((1, E)), _const_spec((1, E)),                          # g2, b2
                _const_spec((E, F_pad)), _const_spec((1, F_pad)),                  # w1, bb1
                _const_spec((F_pad, E)), _const_spec((1, E)),                      # w2, bb2
            ],
            out_specs=pl.BlockSpec((1, TQ, E), lambda b, qi: (b, qi, 0)),
        ),
        compiler_params=pltpu.CompilerParams(
            dimension_semantics=("parallel", "parallel"),
            vmem_limit_bytes=_vmem_limit(
                _main_vmem(S_pad, TQ, E, F_pad, H, ffn_chunk), vmem_cap),
        ),
    )(x_pad, q, k, v,
      kp["wo"], kp["bo"], kp["g2"], kp["b2"],
      kp["w1"], kp["bb1"], kp["w2"], kp["bb2"])


def transformer_encoder(x, kernel_params, num_heads, *, tq=None, ffn_chunk_target=None):
    """x: (B, S, E) float32. kernel_params: list of prepared per-layer dicts."""
    B, S, E = x.shape
    vmem_cap, tq_target = _hw_config()
    if tq is not None:
        tq_target = tq
    TQ = _round_up(min(tq_target, _round_up(S, 8)), 8)
    S_pad = _round_up(S, TQ)
    if S_pad != S:
        x = jnp.pad(x, ((0, 0), (0, S_pad - S), (0, 0)))   # padded keys masked in-kernel
    for kp in kernel_params:
        x = _encoder_layer(x, kp, num_heads, seq_len=S, TQ=TQ,
                           vmem_cap=vmem_cap, ffn_chunk_target=ffn_chunk_target)
    return x[:, :S, :] if S_pad != S else x


# ----------------------- parameters (logical + kernel layouts) ----------------

def init_layer_params(key, embed_dim, ffn_dim):
    """Logical per-layer parameters (y = x @ W + b layout)."""
    ks = jax.random.split(key, 8)
    E, F = embed_dim, ffn_dim
    s = 0.05

    def w(k, shape):
        # round through bf16 so the reference uses exactly the kernel's weight values
        return (jax.random.normal(k, shape, jnp.float32) * s).astype(jnp.bfloat16)

    wq = w(ks[0], (E, E)); wk = w(ks[1], (E, E)); wv = w(ks[2], (E, E))
    wo = w(ks[3], (E, E)); w1 = w(ks[4], (E, F)); w2 = w(ks[5], (F, E))
    bq = jax.random.normal(ks[6], (1, E), jnp.float32) * s
    bv = jax.random.normal(ks[7], (1, E), jnp.float32) * s
    bk = jnp.zeros((1, E), jnp.float32)
    bo = jnp.zeros((1, E), jnp.float32)
    bb1 = jnp.zeros((1, F), jnp.float32)
    bb2 = jnp.zeros((1, E), jnp.float32)
    g1 = jnp.ones((1, E), jnp.float32); b1 = jnp.zeros((1, E), jnp.float32)
    g2 = jnp.ones((1, E), jnp.float32); b2 = jnp.zeros((1, E), jnp.float32)
    return dict(g1=g1, b1=b1, wq=wq, wk=wk, wv=wv, bq=bq, bk=bk, bv=bv,
                wo=wo, bo=bo, g2=g2, b2=b2, w1=w1, bb1=bb1, w2=w2, bb2=bb2)


def prepare_layer_params(p, num_heads):
    """One-time constant folds for the kernel: fuse Wq|Wk|Wv, fold 1/sqrt(Dh) into
    Wq/bq, pad FFN dims to a lane-friendly size, cast weights to bf16."""
    E = p["wq"].shape[0]
    F = p["w1"].shape[1]
    Dh = E // num_heads
    scale = 1.0 / math.sqrt(Dh)
    f32 = lambda t: t.astype(jnp.float32)

    wqkv = jnp.concatenate([f32(p["wq"]) * scale, f32(p["wk"]), f32(p["wv"])],
                           axis=1).astype(jnp.bfloat16)                      # (E, 3E)
    bqkv = jnp.concatenate([p["bq"] * scale, p["bk"], p["bv"]], axis=1)      # (1, 3E) f32

    F_pad = F if F <= 128 else _round_up(F, 128)
    w1, bb1, w2 = f32(p["w1"]), p["bb1"], f32(p["w2"])
    if F_pad != F:                       # zero-padding is exact: relu(0)*0 contributes 0
        w1 = jnp.pad(w1, ((0, 0), (0, F_pad - F)))
        bb1 = jnp.pad(bb1, ((0, 0), (0, F_pad - F)))
        w2 = jnp.pad(w2, ((0, F_pad - F), (0, 0)))

    return dict(g1=p["g1"], b1=p["b1"], wqkv=wqkv, bqkv=bqkv,
                wo=p["wo"].astype(jnp.bfloat16), bo=p["bo"],
                g2=p["g2"], b2=p["b2"],
                w1=w1.astype(jnp.bfloat16), bb1=bb1,
                w2=w2.astype(jnp.bfloat16), bb2=p["bb2"])


# ----------------------- pure-JAX reference (f32) -----------------------------

def encoder_layer_ref(x, p, num_heads):
    B, S, E = x.shape
    H = num_heads
    Dh = E // H
    f32 = lambda t: t.astype(jnp.float32)

    def ln(v, g, b, eps=1e-5):
        mu = v.mean(-1, keepdims=True)
        var = ((v - mu) ** 2).mean(-1, keepdims=True)
        return (v - mu) / jnp.sqrt(var + eps) * g + b

    xn = ln(x, p["g1"][0], p["b1"][0])
    q = xn @ f32(p["wq"]) + p["bq"][0]
    k = xn @ f32(p["wk"]) + p["bk"][0]
    v = xn @ f32(p["wv"]) + p["bv"][0]
    split = lambda t: t.reshape(B, S, H, Dh).transpose(0, 2, 1, 3)
    qh, kh, vh = split(q), split(k), split(v)
    s = jnp.einsum("bhqd,bhkd->bhqk", qh, kh) / math.sqrt(Dh)
    a = jax.nn.softmax(s, axis=-1)
    attn = jnp.einsum("bhqk,bhkd->bhqd", a, vh).transpose(0, 2, 1, 3).reshape(B, S, E)
    attn = attn @ f32(p["wo"]) + p["bo"][0]
    x1 = x + attn
    xn2 = ln(x1, p["g2"][0], p["b2"][0])
    h1 = jax.nn.relu(xn2 @ f32(p["w1"]) + p["bb1"][0])
    ffn = h1 @ f32(p["w2"]) + p["bb2"][0]
    return x1 + ffn


def transformer_encoder_ref(x, layer_params, num_heads):
    for p in layer_params:
        x = encoder_layer_ref(x, p, num_heads)
    return x


# --------------------------------- main ---------------------------------------

if __name__ == "__main__":
    keys = jax.random.split(jax.random.PRNGKey(0), 6)

    # ---- test 1: small shapes (no padding, single KV chunk, unrolled paths) ----
    B, S, E, H, F = 2, 8, 32, 4, 64
    NUM_LAYERS = 2
    x = jax.random.normal(keys[0], (B, S, E), jnp.float32)
    layer_params = [init_layer_params(keys[1 + i], E, F) for i in range(NUM_LAYERS)]
    kernel_params = [prepare_layer_params(p, H) for p in layer_params]

    out = jax.block_until_ready(transformer_encoder(x, kernel_params, num_heads=H))
    assert out.shape == (B, S, E) and out.dtype == jnp.float32
    assert bool(jnp.all(jnp.isfinite(out)))
    ref = transformer_encoder_ref(x, layer_params, num_heads=H)
    err1 = float(jnp.max(jnp.abs(out - ref)))
    assert err1 < 5e-2, f"test1 max abs error vs f32 reference: {err1}"

    # ---- test 2: padded sequence (1224 -> 1280), masked keys, fori_loop KV path ----
    B2, S2, E2, H2, F2 = 1, 1224, 128, 4, 320
    x2 = jax.random.normal(keys[3], (B2, S2, E2), jnp.float32)
    p2 = [init_layer_params(keys[4], E2, F2)]
    kp2 = [prepare_layer_params(p, H2) for p in p2]
    out2 = jax.block_until_ready(
        transformer_encoder(x2, kp2, num_heads=H2, tq=128, ffn_chunk_target=128))
    assert out2.shape == (B2, S2, E2)
    assert bool(jnp.all(jnp.isfinite(out2)))
    ref2 = transformer_encoder_ref(x2, p2, num_heads=H2)
    err2 = float(jnp.max(jnp.abs(out2 - ref2)))
    assert err2 < 5e-2, f"test2 max abs error vs f32 reference: {err2}"

    print("KERNEL_OK")
</pallas_src>

<mosaic_0001>
module attributes {stable_mosaic.version = 11 : i64} {
  func.func @qkv_projection_kernel(%arg0: i32, %arg1: i32, %arg2: memref<1x8x32xf32, #tpu.memory_space<vmem>>, %arg3: memref<1x32xf32, #tpu.memory_space<vmem>>, %arg4: memref<1x32xf32, #tpu.memory_space<vmem>>, %arg5: memref<32x96xbf16, #tpu.memory_space<vmem>>, %arg6: memref<1x96xf32, #tpu.memory_space<vmem>>, %arg7: memref<1x1x4x8x8xbf16, #tpu.memory_space<vmem>>, %arg8: memref<1x1x4x8x8xbf16, #tpu.memory_space<vmem>>, %arg9: memref<1x1x4x8x8xbf16, #tpu.memory_space<vmem>>) attributes {dimension_semantics = [#tpu.dimension_semantics<parallel>, #tpu.dimension_semantics<parallel>], iteration_bounds = array<i64: 2, 1>, scalar_prefetch = 0 : i64, scratch_operands = 0 : i64, tpu.core_type = #tpu.core_type<tc>, window_params = [{transform_indices = @transform_0, window_bounds = array<i64: 1, 8, 32>}, {pipeline_mode = #tpu.pipeline_mode<synchronous>, transform_indices = @transform_1, window_bounds = array<i64: 1, 32>}, {pipeline_mode = #tpu.pipeline_mode<synchronous>, transform_indices = @transform_2, window_bounds = array<i64: 1, 32>}, {pipeline_mode = #tpu.pipeline_mode<synchronous>, transform_indices = @transform_3, window_bounds = array<i64: 32, 96>}, {pipeline_mode = #tpu.pipeline_mode<synchronous>, transform_indices = @transform_4, window_bounds = array<i64: 1, 96>}, {transform_indices = @transform_5, window_bounds = array<i64: 1, 1, 4, 8, 8>}, {transform_indices = @transform_6, window_bounds = array<i64: 1, 1, 4, 8, 8>}, {transform_indices = @transform_7, window_bounds = array<i64: 1, 1, 4, 8, 8>}]} {
    %c0 = arith.constant 0 : index
    %c0_0 = arith.constant 0 : index
    %c0_1 = arith.constant 0 : index
    %0 = vector.load %arg2[%c0, %c0_0, %c0_1] : memref<1x8x32xf32, #tpu.memory_space<vmem>>, vector<1x8x32xf32>
    %1 = vector.shape_cast %0 : vector<1x8x32xf32> to vector<8x32xf32>
    %c0_2 = arith.constant 0 : index
    %c0_3 = arith.constant 0 : index
    %2 = vector.load %arg3[%c0_2, %c0_3] : memref<1x32xf32, #tpu.memory_space<vmem>>, vector<1x32xf32>
    %c0_4 = arith.constant 0 : index
    %c0_5 = arith.constant 0 : index
    %3 = vector.load %arg4[%c0_4, %c0_5] : memref<1x32xf32, #tpu.memory_space<vmem>>, vector<1x32xf32>
    %cst = arith.constant dense<0.000000e+00> : vector<8xf32>
    %4 = vector.multi_reduction <add>, %1, %cst [1] : vector<8x32xf32> to vector<8xf32>
    %5 = vector.shape_cast %4 : vector<8xf32> to vector<8x1xf32>
    %cst_6 = arith.constant 3.200000e+01 : f32
    %6 = vector.broadcast %cst_6 : f32 to vector<8x1xf32>
    %7 = arith.divf %5, %6 : vector<8x1xf32>
    %8 = vector.broadcast %7 : vector<8x1xf32> to vector<8x32xf32>
    %9 = arith.subf %1, %8 : vector<8x32xf32>
    %10 = arith.mulf %9, %9 : vector<8x32xf32>
    %cst_7 = arith.constant dense<0.000000e+00> : vector<8xf32>
    %11 = vector.multi_reduction <add>, %10, %cst_7 [1] : vector<8x32xf32> to vector<8xf32>
    %12 = vector.shape_cast %11 : vector<8xf32> to vector<8x1xf32>
    %cst_8 = arith.constant 3.200000e+01 : f32
    %13 = vector.broadcast %cst_8 : f32 to vector<8x1xf32>
    %14 = arith.divf %12, %13 : vector<8x1xf32>
    %15 = vector.broadcast %7 : vector<8x1xf32> to vector<8x32xf32>
    %16 = arith.subf %1, %15 : vector<8x32xf32>
    %cst_9 = arith.constant 9.99999974E-6 : f32
    %17 = vector.broadcast %cst_9 : f32 to vector<8x1xf32>
    %18 = arith.addf %14, %17 : vector<8x1xf32>
    %19 = math.rsqrt %18 : vector<8x1xf32>
    %20 = vector.broadcast %19 : vector<8x1xf32> to vector<8x32xf32>
    %21 = arith.mulf %16, %20 : vector<8x32xf32>
    %22 = vector.broadcast %2 : vector<1x32xf32> to vector<8x32xf32>
    %23 = arith.mulf %21, %22 : vector<8x32xf32>
    %24 = vector.broadcast %3 : vector<1x32xf32> to vector<8x32xf32>
    %25 = arith.addf %23, %24 : vector<8x32xf32>
    %26 = arith.truncf %25 : vector<8x32xf32> to vector<8x32xbf16>
    %c0_10 = arith.constant 0 : index
    %c0_11 = arith.constant 0 : index
    %27 = vector.load %arg5[%c0_10, %c0_11] : memref<32x96xbf16, #tpu.memory_space<vmem>>, vector<32x96xbf16>
    %cst_12 = arith.constant dense<0.000000e+00> : vector<8x96xf32>
    %28 = tpu.matmul %26, %27, %cst_12 {dimension_numbers = #tpu.dot_dimension_numbers<[1], [0], [0], [1], [0, 0, 1, 1], [], []>} : vector<8x32xbf16>, vector<32x96xbf16>, vector<8x96xf32> -> vector<8x96xf32>
    %c0_13 = arith.constant 0 : index
    %c0_14 = arith.constant 0 : index
    %29 = vector.load %arg6[%c0_13, %c0_14] : memref<1x96xf32, #tpu.memory_space<vmem>>, vector<1x96xf32>
    %30 = vector.broadcast %29 : vector<1x96xf32> to vector<8x96xf32>
    %31 = arith.addf %28, %30 : vector<8x96xf32>
    %32 = vector.extract_strided_slice %31 {offsets = [0, 0], sizes = [8, 32], strides = [1, 1]} : vector<8x96xf32> to vector<8x32xf32>
    %33 = vector.extract_strided_slice %31 {offsets = [0, 32], sizes = [8, 32], strides = [1, 1]} : vector<8x96xf32> to vector<8x32xf32>
    %34 = vector.extract_strided_slice %31 {offsets = [0, 64], sizes = [8, 32], strides = [1, 1]} : vector<8x96xf32> to vector<8x32xf32>
    %35 = vector.shape_cast %32 : vector<8x32xf32> to vector<8x4x8xf32>
    %36 = tpu.transpose %35, [1, 0, 2] : vector<8x4x8xf32> -> vector<4x8x8xf32>
    %37 = arith.truncf %36 : vector<4x8x8xf32> to vector<4x8x8xbf16>
    %c0_15 = arith.constant 0 : index
    %c0_16 = arith.constant 0 : index
    %c0_17 = arith.constant 0 : index
    %c0_18 = arith.constant 0 : index
    %c0_19 = arith.constant 0 : index
    %38 = vector.load %arg7[%c0_15, %c0_16, %c0_17, %c0_18, %c0_19] : memref<1x1x4x8x8xbf16, #tpu.memory_space<vmem>>, vector<1x1x4x8x8xbf16>
    %39 = vector.shape_cast %38 : vector<1x1x4x8x8xbf16> to vector<4x8x8xbf16>
    %40 = vector.shape_cast %37 : vector<4x8x8xbf16> to vector<1x1x4x8x8xbf16>
    tpu.vector_store %arg7[%c0_15, %c0_16, %c0_17, %c0_18, %c0_19], %40 {strides = array<i32>} : memref<1x1x4x8x8xbf16, #tpu.memory_space<vmem>>, vector<1x1x4x8x8xbf16>,
    %41 = vector.shape_cast %34 : vector<8x32xf32> to vector<8x4x8xf32>
    %42 = tpu.transpose %41, [1, 0, 2] : vector<8x4x8xf32> -> vector<4x8x8xf32>
    %43 = arith.truncf %42 : vector<4x8x8xf32> to vector<4x8x8xbf16>
    %c0_20 = arith.constant 0 : index
    %c0_21 = arith.constant 0 : index
    %c0_22 = arith.constant 0 : index
    %c0_23 = arith.constant 0 : index
    %c0_24 = arith.constant 0 : index
    %44 = vector.load %arg9[%c0_20, %c0_21, %c0_22, %c0_23, %c0_24] : memref<1x1x4x8x8xbf16, #tpu.memory_space<vmem>>, vector<1x1x4x8x8xbf16>
    %45 = vector.shape_cast %44 : vector<1x1x4x8x8xbf16> to vector<4x8x8xbf16>
    %46 = vector.shape_cast %43 : vector<4x8x8xbf16> to vector<1x1x4x8x8xbf16>
    tpu.vector_store %arg9[%c0_20, %c0_21, %c0_22, %c0_23, %c0_24], %46 {strides = array<i32>} : memref<1x1x4x8x8xbf16, #tpu.memory_space<vmem>>, vector<1x1x4x8x8xbf16>,
    %47 = tpu.transpose %33, [1, 0] : vector<8x32xf32> -> vector<32x8xf32>
    %48 = vector.shape_cast %47 : vector<32x8xf32> to vector<4x8x8xf32>
    %49 = arith.truncf %48 : vector<4x8x8xf32> to vector<4x8x8xbf16>
    %c0_25 = arith.constant 0 : index
    %c0_26 = arith.constant 0 : index
    %c0_27 = arith.constant 0 : index
    %c0_28 = arith.constant 0 : index
    %c0_29 = arith.constant 0 : index
    %50 = vector.load %arg8[%c0_25, %c0_26, %c0_27, %c0_28, %c0_29] : memref<1x1x4x8x8xbf16, #tpu.memory_space<vmem>>, vector<1x1x4x8x8xbf16>
    %51 = vector.shape_cast %50 : vector<1x1x4x8x8xbf16> to vector<4x8x8xbf16>
    %52 = vector.shape_cast %49 : vector<4x8x8xbf16> to vector<1x1x4x8x8xbf16>
    tpu.vector_store %arg8[%c0_25, %c0_26, %c0_27, %c0_28, %c0_29], %52 {strides = array<i32>} : memref<1x1x4x8x8xbf16, #tpu.memory_space<vmem>>, vector<1x1x4x8x8xbf16>,
    return
  }
  func.func @transform_0(%arg0: i32, %arg1: i32) -> (i32, i32, i32) {
    %c0_i32 = arith.constant 0 : i32
    %c0_i32_0 = arith.constant 0 : i32
    return %arg0, %arg1, %c0_i32 : i32, i32, i32
  }
  func.func @transform_1(%arg0: i32, %arg1: i32) -> (i32, i32) {
    %c0_i32 = arith.constant 0 : i32
    %c0_i32_0 = arith.constant 0 : i32
    %c0_i32_1 = arith.constant 0 : i32
    return %c0_i32, %c0_i32_0 : i32, i32
  }
  func.func @transform_2(%arg0: i32, %arg1: i32) -> (i32, i32) {
    %c0_i32 = arith.constant 0 : i32
    %c0_i32_0 = arith.constant 0 : i32
    %c0_i32_1 = arith.constant 0 : i32
    return %c0_i32, %c0_i32_0 : i32, i32
  }
  func.func @transform_3(%arg0: i32, %arg1: i32) -> (i32, i32) {
    %c0_i32 = arith.constant 0 : i32
    %c0_i32_0 = arith.constant 0 : i32
    %c0_i32_1 = arith.constant 0 : i32
    return %c0_i32, %c0_i32_0 : i32, i32
  }
  func.func @transform_4(%arg0: i32, %arg1: i32) -> (i32, i32) {
    %c0_i32 = arith.constant 0 : i32
    %c0_i32_0 = arith.constant 0 : i32
    %c0_i32_1 = arith.constant 0 : i32
    return %c0_i32, %c0_i32_0 : i32, i32
  }
  func.func @transform_5(%arg0: i32, %arg1: i32) -> (i32, i32, i32, i32, i32) {
    %c0_i32 = arith.constant 0 : i32
    %c0_i32_0 = arith.constant 0 : i32
    %c0_i32_1 = arith.constant 0 : i32
    %c0_i32_2 = arith.constant 0 : i32
    return %arg0, %arg1, %c0_i32, %c0_i32_0, %c0_i32_1 : i32, i32, i32, i32, i32
  }
  func.func @transform_6(%arg0: i32, %arg1: i32) -> (i32, i32, i32, i32, i32) {
    %c0_i32 = arith.constant 0 : i32
    %c0_i32_0 = arith.constant 0 : i32
    %c0_i32_1 = arith.constant 0 : i32
    %c0_i32_2 = arith.constant 0 : i32
    return %arg0, %arg1, %c0_i32, %c0_i32_0, %c0_i32_1 : i32, i32, i32, i32, i32
  }
  func.func @transform_7(%arg0: i32, %arg1: i32) -> (i32, i32, i32, i32, i32) {
    %c0_i32 = arith.constant 0 : i32
    %c0_i32_0 = arith.constant 0 : i32
    %c0_i32_1 = arith.constant 0 : i32
    %c0_i32_2 = arith.constant 0 : i32
    return %arg0, %arg1, %c0_i32, %c0_i32_0, %c0_i32_1 : i32, i32, i32, i32, i32
  }
}

</mosaic_0001>

<bundles_post_ra>
// kernel: tpu_custom_call.1
= control target key start
LH: loop header
LB: loop body
LE: loop exit
PB: predicated region body
PF: predicated region fallthrough
CT: control target
= control target key end

     0   :  { %s1797_s0 = inlined_call_operand.hbm [shape: f32[2,8,32], index: 0, kind: input, shape index: {}]   ;;  %s1798_s1 = inlined_call_operand.vmem [shape: f32[1,32], index: 1, kind: input, shape index: {}]   ;;  %s1799_s2 = inlined_call_operand.vmem [shape: f32[1,32], index: 2, kind: input, shape index: {}]   ;;  %s1800_s3 = inlined_call_operand.hbm [shape: bf16[32,96], index: 3, kind: input, shape index: {}]   ;;  %s1801_s4 = inlined_call_operand.vmem [shape: f32[1,96], index: 4, kind: input, shape index: {}]   ;;  %s1802_s5 = inlined_call_operand.hbm [shape: bf16[2,1,4,8,8], index: 5, kind: output, shape index: {0}]   ;;  %s1803_s6 = inlined_call_operand.hbm [shape: bf16[2,1,4,8,8], index: 6, kind: output, shape index: {1}]   ;;  %s1804_s7 = inlined_call_operand.hbm [shape: bf16[2,1,4,8,8], index: 7, kind: output, shape index: {2}]  }
   0x1   :  { %1810 = sst [smem:[#allocation16_spill]] %s1800_s3 }
   0x2   :  { %13 = vsyncpa [#allocation3], 0 }
   0x3   :  { %15 = vsyncpa [#allocation3 + $0x1], 0 }
   0x4   :  { %16 = vsyncpa [#allocation6], 0 }
   0x5   :  { %17 = vsyncpa [#allocation4], 0 }
   0x6   :  { %19 = vsyncpa [#allocation4 + $0x1], 0 }
   0x7   :  { %20 = vsyncpa [#allocation9], 0 }
   0x8   :  { %22 = vsyncpa [#allocation9 + $0x1], 0  ;;  %s1436_s24 = smov 0   ;;  %s1438_s25 = smov 0  }
   0x9   :  { %s1440_s26 = smov 0   ;;  %s1442_s27 = smov 0  }
   0xa   :  { %s1444_s28 = smov 0   ;;  %s1446_s29 = smov 0  }
   0xb LB: > { %s1467_s30 = sadd.s32 4294967295, %s1377_s29   ;;  %s1808_s8 = sadd.s32 4294967294, %s1377_s29   ;;  %s1377_s29 = sphi %s1446_s29, %s28_s29   ;;  %s1373_s28 = sphi %s1444_s28, %s1833_s28   ;;  %s1369_s27 = sphi %s1442_s27, %s1832_s27   ;;  %s1365_s26 = sphi %s1440_s26, %s1831_s26   ;;  %s1361_s25 = sphi %s1438_s25, %s1830_s25   ;;  %s1357_s24 = sphi %s1436_s24, %s1829_s24  }
   0xc   : > { %p62_p0 = scmp.ne.s32.totalorder %s1361_s25, %s1357_s24  ;;  %p1805_p1 = scmp.eq.s32.totalorder %s1467_s30, 0 }
   0xd   : > { %p178_p3 = scmp.eq.s32.totalorder %s1808_s8, 1  ;;  %p1028_p5 = scmp.ge.s32.totalorder %s1377_s29, 1 }
   0xe   : > { %p1478_p4 = por %p1805_p1, %p62_p0  ;;  %p241_p7 = scmp.lt.s32.totalorder %s1377_s29, 3 }
   0xf   : > { %p1483_p6 = por %p178_p3, %p62_p0  ;;  %s1379_s12 = smov [#allocation5]  }
  0x10   : > { %s1811_s9 = scalar_select %p1478_p4, 1, 0 }
  0x11   : > { %s1812_s10 = scalar_select %p1483_p6, 1, 0 }
  0x12   : > { %p1488_p8 = pnand %p1028_p5, %p241_p7  ;;  %s259_s13 = sshll.u32 %s1379_s12, 4  ;;  %s260_s13 = int_to_ptr.vmem [resolvable:$true] %s259_s13 }
  0x13   : > { %s40_s15 = sadd.s32 1, %s1373_s28  ;;  %s1815_s3 = sld [smem:[#allocation16_spill]] }
  0x14   : > { %s1813_s11 = scalar_select %p1488_p8, 1, 0 }
  0x15   : > { %p1086_p9 = pneg %p1488_p8 }
  0x17   : > { %p1497_p11 = pnand %p1086_p9, %p1805_p1 }
  0x19   : > { %s1173_s18 = scalar_lea.hbm %s1815_s3, 256  ;;  %p1175_p13 = pneg %p1497_p11 }
  0x1a   : > { %p1174_p12 = scmp.ne.s32.totalorder %s1815_s3, %s1173_s18  ;;  %p1180_p5 = scmp.lt.u32.totalorder %s1173_s18, %s1815_s3 }
  0x1c   : > { %p1176_p0 = pnand %p1175_p13, %p1174_p12 }
  0x1e   : > { %p1177_p3 = pneg %p1176_p0 }
  0x20   : > { %p1182_p7 = pnand %p1180_p5, %p1177_p3 }
  0x22   : > { %1185 = shalt.err (!%p1182_p7)
}
  0x23   : > { %s1186_s23 = scalar_lea.vmem %s260_s13, 256  ;;  %p1194_p2 = scmp.lt.s32.totalorder %s260_s13, %s260_s13 }
  0x24   : > { %p1187_p9 = scmp.ne.s32.totalorder %s260_s13, %s1186_s23  ;;  %p1195_p6 = scmp.lt.s32.totalorder %s1186_s23, %s1186_s23 }
  0x26   : > { %p1189_p10 = pnand %p1187_p9, %p1175_p13  ;;  %p1196_p4 = por %p1195_p6, %p1194_p2 }
  0x28   : > { %p1190_p1 = pneg %p1189_p10 }
  0x2a   : > { %p1197_p8 = pnand %p1196_p4, %p1190_p1 }
  0x2c   : > { %1200 = shalt.err (!%p1197_p8)
}
  0x2d   : > { %s1380_s12 = smov 64   ;;  %s1381_s16 = smov 4  }
  0x2e   : > { %1089 = dma.hbm_to_vmem [thread:$0]  (!%p1497_p11), %s1815_s3, 256, %s260_s13, [#allocation6], %s1380_s12, %s1380_s12, %s1381_s16  }
  0x2f   : > { %p42_p1 = scmp.ge.s32.totalorder %s40_s15, 2  ;;  %s49_s19 = sadd.s32 1, %s1365_s26 }
  0x30   : > { %p56_p2 = scmp.ne.s32.totalorder %s1365_s26, %s1361_s25  ;;  %p57_p4 = scmp.eq.s32.totalorder %s1377_s29, 0 }
  0x31   : > { %s1835_s15 = smov (%p42_p1, %s40_s15), 0  ;;  %p1818_p8 = scmp.eq.s32.totalorder %s1467_s30, 1 }
  0x32   : > { %1816 = sst [smem:[#allocation15_spill]] %s1835_s15  ;;  %p1524_p6 = por %p57_p4, %p56_p2 }
  0x33   : > { %p1530_p10 = por %p1818_p8, %p56_p2  ;;  %s44_s14 = ssub.s32 %s1373_s28, %s1835_s15 }
  0x34   : > { %p1105_p12 = scmp.lt.s32.totalorder %s1377_s29, 2  ;;  %p47_p11 = scmp.eq.s32.totalorder %s44_s14, 0 }
  0x35   : > { %s276_s13 = sand.u32 1, %s1365_s26   ;;  %s1032_s12 = sshll.u32 %s1373_s28, 7 }
  0x36   : > { %s1031_s22 = sshll.u32 %s276_s13, 3  ;;  %s1545_s18 = scalar_lea.hbm %s1797_s0, %s1032_s12 }
  0x37   : > { %s1539_s23 = scalar_select %p47_p11, %s1365_s26, %s49_s19  }
  0x38   : > { %s280_s8 = scalar_lea.vmem [#allocation2], %s1031_s22  ;;  %p1551_p13 = pnand %p1105_p12, %p1524_p6 }
  0x39   : > { %s288_s3 = sshll.u32 %s280_s8, 4  ;;  %s277_s19 = scalar_lea.sflag [#allocation3], %s276_s13  ;;  %s1547_s3 = int_to_ptr.vmem [resolvable:$true] %s288_s3 }
  0x3a   : > { %s1201_s15 = scalar_lea.hbm %s1545_s18, 128  ;;  %p1203_p3 = pneg %p1551_p13 }
  0x3b   : > { %p1202_p0 = scmp.ne.s32.totalorder %s1545_s18, %s1201_s15  ;;  %s1206_s12 = scalar_lea.hbm %s1797_s0, 256 }
  0x3c   : > { %p1207_p9 = scmp.lt.u32.totalorder %s1545_s18, %s1797_s0  ;;  %p1208_p1 = scmp.lt.u32.totalorder %s1206_s12, %s1201_s15 }
  0x3d   : > { %p1204_p5 = pnand %p1203_p3, %p1202_p0  ;;  %p1210_p4 = scmp.lt.u32.totalorder %s1201_s15, %s1545_s18 }
  0x3e   : > { %p1209_p2 = por %p1208_p1, %p1207_p9 }
  0x3f   : > { %p1205_p7 = pneg %p1204_p5 }
  0x40   : > { %p1211_p6 = por %p1210_p4, %p1209_p2 }
  0x42   : > { %p1212_p8 = pnand %p1211_p6, %p1205_p7 }
  0x44   : > { %1215 = shalt.err (!%p1212_p8)
}
  0x45   : > { %s1216_s13 = scalar_lea.vmem %s1547_s3, 128  ;;  %s1382_s17 = smov [#allocation2]  }
  0x46   : > { %p1217_p12 = scmp.ne.s32.totalorder %s1547_s3, %s1216_s13  ;;  %s1221_s22 = sshll.u32 %s1382_s17, 4  ;;  %s1222_s22 = int_to_ptr.vmem [resolvable:$false] %s1221_s22 }
  0x47   : > { %s1223_s8 = scalar_lea.vmem %s1222_s22, 256  ;;  %p1224_p5 = scmp.lt.s32.totalorder %s1547_s3, %s1222_s22 }
  0x48   : > { %p1219_p11 = pnand %p1217_p12, %p1203_p3  ;;  %p1225_p9 = scmp.lt.s32.totalorder %s1223_s8, %s1216_s13 }
  0x4a   : > { %p1220_p0 = pneg %p1219_p11  ;;  %p1226_p1 = por %p1225_p9, %p1224_p5 }
  0x4c   : > { %p1227_p2 = pnand %p1226_p1, %p1220_p0 }
  0x4e   : > { %1230 = shalt.err (!%p1227_p2)
}
  0x4f   : > { %1093 = dma.hbm_to_vmem [thread:$0]  (!%p1551_p13), %s1545_s18, 128, %s1547_s3, %s277_s19  }
  0x50   : > { %p1821_p7 = scmp.ne.s32.totalorder %s1813_s11, 0 }
  0x51   : > { %s1583_s15 = sand.u32 (!%p1821_p7), 1, %s1361_s25   ;;  %p1822_p3 = scmp.ne.s32.totalorder (!%p1821_p7), %s1811_s9, 0 }
  0x52   : > { %297 = sbr.rel (%p1821_p7) target bundleno = 966 (0x3c6), region = 40  ;;  %s1034_s12 = sshll.u32 (!%p1821_p7), %s1583_s15, 3 }
  0x53   : > { %s300_s20 = scalar_lea.sflag (!%p1821_p7), [#allocation3], %s1583_s15  ;;  %s303_s16 = scalar_lea.vmem (!%p1821_p7), [#allocation2], %s1034_s12 }
  0x59   : > { %1340 = dma.done.wait (%p1822_p3), %s300_s20, 128  }
  0x5a   : > { %1342 = vsyncadd (%p1822_p3), %s300_s20, 4294967168  ;;  %p1823_p4 = scmp.eq.s32.totalorder %s1467_s30, 0 }
  0x5c   : > { %1344 = dma.done.wait (%p1823_p4), [#allocation6], 256   ;;  %p1824_p13 = pmov %p1823_p4 }
  0x5d   : > { %vm352_vm0 = vcmask 261120   ;;  %v349_v0 = vld [vmem:[%s303_s16] sm:$0xff]  ;;  %v1169_v7 = vld [vmem:[#allocation5] sm:$0xff]   ;;  %v1383_v8 = vmov 0.0   ;;  %vm1384_vm1 = vmmov 0   ;;  %v1170_v9 = vld [vmem:[#allocation5 + $0x8] sm:$0xff]   ;;  %v463_v28 = vlaneseq }
  0x5e   : > { %1346 = vsyncadd (%p1824_p13), [#allocation6], 4294967040  ;;  %v353_v1 = vsel %vm352_vm0, %v349_v0, 0.0  ;;  %1066 = vmatprep.subr.bf16.mxu0 %v1383_v8  ;;  %1070 = vmatprep.mubr.msk.bf16.mxu0 %vm1384_vm1, %v1383_v8  ;;  %v1039_v14 = vld [vmem:[%s1798_s1] ss:$0 sm:$0xff]  ;;  %s1385_s13 = smov 104  }
  0x5f   : > { %354 = vadd.xlane.f32.xlu0 %v353_v1  ;;  %1067 = vmatpush3.bf16.msra.mxu0 %v1169_v7  ;;  %v1040_v16 = vld [vmem:[%s1799_s2] ss:$0 sm:$0xff]  ;;  %s1386_s17 = smov 120   ;;  %s1387_s22 = smov 112   ;;  %v1390_v26 = vmov 1983009808  }
  0x60   : > { %1068 = vmatprep.subr.bf16.mxu0 %v1383_v8  ;;  %v1041_v20 = vld [vmem:[%s1801_s4] ss:$0 sm:$0xff]  ;;  %s1388_s8 = smov 96   ;;  %s1389_s12 = smov 64   ;;  %v461_v27 = vunpack.c.l.s4 %v1390_v26  ;;  %v1391_v29 = vmov 1934713408  }
  0x61   : > { %v493_v30 = vunpack.c.l.s4 %v1391_v29  ;;  %v464_v32 = vshrl.u32 %v463_v28, 7  ;;  %s1632_s20 = sshll.u32 %s1583_s15, 4  ;;  %vm598_vm2 = vcmask 60416   ;;  %s1640_s3 = sshll.u32 %s1369_s27, 8 }
  0x62   : > { %v462_v31 = vunpack.c.0.s8 %v461_v27  ;;  %s333_s16 = scalar_lea.vmem [#allocation7], %s1632_s20  ;;  %s1646_s18 = scalar_lea.hbm %s1802_s5, %s1640_s3 }
  0x63   : > { %1069 = vmatpush3.bf16.msra.mxu0 %v1170_v9  ;;  %v494_v35 = vunpack.c.0.s8 %v493_v30  ;;  %s828_s14 = sshll.u32 %s333_s16, 4  ;;  %s803_s19 = scalar_lea.sflag [#allocation4], %s1583_s15  ;;  %s1648_s14 = int_to_ptr.vmem [resolvable:$true] %s828_s14 }
  0x64   : > { %v1609_v36 = vsub.s32 %v462_v31, %v464_v32  ;;  %s1392_s27 = smov [#allocation7]  }
  0x65   : > { %v1612_v42 = vsub.s32 %v494_v35, %v464_v32 }
  0xec   : > { %v355_v2 = vpop.xlane.xlu0 %354 }
  0xed   : > { %v357_v3 = vmul.f32 0.03125, %v355_v2 }
  0xef   : > { %v358_v4 = vsub.f32 %v349_v0, %v357_v3 }
  0xf1   : > { %v359_v5 = vmul.f32 %v358_v4, %v358_v4 }
  0xf3   : > { %v360_v6 = vsel %vm352_vm0, %v359_v5, 0.0 }
  0xf4   : > { %361 = vadd.xlane.f32.xlu0 %v360_v6 }
 0x181   : > { %v362_v10 = vpop.xlane.xlu0 %361 }
 0x182   : > { %v363_v11 = vmul.f32 0.03125, %v362_v10 }
 0x184   : > { %v364_v12 = vadd.f32 1e-05, %v363_v11 }
 0x186   : > { %1171 = vrsqrt.f32 %v364_v12 }
 0x190   : > { %v1172_v13 = vpop.eup %1171 }
 0x191   : > { %v366_v15 = vmul.f32 %v1172_v13, %v358_v4 }
 0x193   : > { %v373_v17 = vmul.f32 %v1039_v14, %v366_v15 }
 0x195   : > { %v380_v18 = vadd.f32 %v1040_v16, %v373_v17 }
 0x197   : > { %v381_v19 = vpack.c.bf16 %v380_v18, %v380_v18 }
 0x199   : > { %1071 = vmatmul.mubr.msk.bf16.vlgmr.msra.gmra.mrb[0].mxu0 %vm352_vm0, %v381_v19 }
 0x26c   : > { %v442_v21 = vpop.f32.mrb[0].mxu0 }
 0x26d   : > { %v443_v22 = vadd.f32 %v1041_v20, %v442_v21  ;;  %v1072_v23 = vpop.f32.mrb[1].mxu0 }
 0x26e   : > { %v445_v24 = vpop.f32.mrb[2].mxu0 }
 0x26f   : > { %455 = vrot.lane.b32.xlu0 %v443_v22, %s1385_s13  ;;  %449 = vrot.lane.b32.xlu1 %v443_v22, %s1386_s17  ;;  %v1073_v25 = vpop.f32.mrb[3].mxu0  ;;  %s1231_s13 = scalar_lea.vmem %s1648_s14, 256  ;;  %s1235_s17 = sshll.u32 %s1392_s27, 4  ;;  %s1236_s17 = int_to_ptr.vmem [resolvable:$false] %s1235_s17 }
 0x270   : > { %p1232_p6 = scmp.ne.s32.totalorder %s1648_s14, %s1231_s13  ;;  %p1238_p11 = scmp.lt.s32.totalorder %s1648_s14, %s1236_s17 }
 0x272   : > { %p1233_p8 = pnand %p1232_p6, %p1530_p10 }
 0x273   : > { %452 = vrot.lane.b32.xlu1 %v443_v22, %s1387_s22  ;;  %s1237_s22 = scalar_lea.vmem %s1236_s17, 512 }
 0x274   : > { %p1234_p12 = pneg %p1233_p8  ;;  %p1239_p0 = scmp.lt.s32.totalorder %s1237_s22, %s1231_s13 }
 0x276   : > { %p1240_p5 = por %p1239_p0, %p1238_p11 }
 0x277   : > { %759 = vrot.lane.b32.xlu1 %v443_v22, %s1388_s8 }
 0x278   : > { %p1241_p9 = pnand %p1240_p5, %p1234_p12 }
 0x27b   : > { %603 = vrot.lane.b32.xlu1 %v443_v22, %s1389_s12 }
 0x2e1   : > { %v456_v33 = vpop.permute.xlu0 %455  ;;  %v450_v34 = vpop.permute.xlu1 %449 }
 0x2e2   : > { %605 = vrot.lane.b32.xlu1 %v450_v34, %s1389_s12  ;;  %v474_v37 = vcombine.low %v450_v34, %v456_v33  ;;  %v475_v38 = vcombine.high %v450_v34, %v456_v33 }
 0x2e4   : > { %v482_v43 = vrot.slane %v474_v37, %v1609_v36  ;;  %v489_v44 = vrot.slane %v475_v38, %v1609_v36 }
 0x2e5   : > { %v453_v39 = vpop.permute.xlu1 %452 }
 0x2e6   : > { %v458_v40 = vcombine.low %v443_v22, %v453_v39  ;;  %v459_v41 = vcombine.high %v443_v22, %v453_v39  ;;  %607 = vrot.lane.b32.xlu1 %v453_v39, %s1389_s12 }
 0x2e8   : > { %v466_v45 = vrot.slane %v458_v40, %v1609_v36  ;;  %v473_v46 = vrot.slane %v459_v41, %v1609_v36 }
 0x2e9   : > { %v760_v15 = vpop.permute.xlu1 %759 }
 0x2ea   : > { %v490_v47 = vcombine.low %v466_v45, %v482_v43  ;;  %v491_v48 = vcombine.high %v466_v45, %v482_v43  ;;  %v506_v49 = vcombine.low %v473_v46, %v489_v44  ;;  %v507_v50 = vcombine.high %v473_v46, %v489_v44  ;;  %609 = vrot.lane.b32.xlu1 %v456_v33, %s1389_s12 }
 0x2ec   : > { %v498_v51 = vrot.slane %v490_v47, %v1612_v42  ;;  %v505_v52 = vrot.slane %v491_v48, %v1612_v42  ;;  %v514_v53 = vrot.slane %v506_v49, %v1612_v42  ;;  %v521_v54 = vrot.slane %v507_v50, %v1612_v42 }
 0x2ee   : > { %v526_v55 = vcombine.low %v498_v51, %v505_v52  ;;  %v1045_v56 = vcombine.high %v498_v51, %v505_v52  ;;  %v542_v57 = vcombine.low %v514_v53, %v521_v54  ;;  %v1046_v58 = vcombine.high %v514_v53, %v521_v54 }
 0x2f0   : > { %v533_v59 = vrot.slane %v526_v55, %v1609_v36  ;;  %v541_v60 = vrot.slane %v1045_v56, %v1609_v36  ;;  %v549_v61 = vrot.slane %v542_v57, %v1609_v36  ;;  %v557_v62 = vrot.slane %v1046_v58, %v1609_v36 }
 0x2f2   : > { %v558_v63 = vcombine.low %v533_v59, %v541_v60  ;;  %v559_v0 = vcombine.high %v533_v59, %v541_v60  ;;  %v574_v1 = vcombine.low %v549_v61, %v557_v62  ;;  %v575_v2 = vcombine.high %v549_v61, %v557_v62 }
 0x2f4   : > { %v566_v3 = vrot.slane %v558_v63, %v1612_v42  ;;  %v573_v4 = vrot.slane %v559_v0, %v1612_v42  ;;  %v582_v5 = vrot.slane %v574_v1, %v1612_v42  ;;  %v589_v6 = vrot.slane %v575_v2, %v1612_v42 }
 0x2f6   : > { %v590_v7 = vcombine.low %v566_v3, %v582_v5  ;;  %v591_v8 = vcombine.high %v566_v3, %v582_v5  ;;  %v592_v9 = vcombine.low %v573_v4, %v589_v6  ;;  %v593_v10 = vcombine.high %v573_v4, %v589_v6 }
 0x2f8   : > { %v594_v11 = vpack.c.bf16 %v590_v7, %v590_v7  ;;  %v595_v12 = vpack.c.bf16 %v591_v8, %v591_v8  ;;  %v596_v13 = vpack.c.bf16 %v592_v9, %v592_v9  ;;  %v597_v14 = vpack.c.bf16 %v593_v10, %v593_v10 }
 0x2fa   : > { %599 = vst.msk [vmem:[%s333_s16] sm:$0xf] %vm598_vm2, %v594_v11  ;;  %600 = vst.msk [vmem:[%s333_s16 + $0x4] sm:$0xf] %vm598_vm2, %v595_v12 }
 0x2fb   : > { %601 = vst.msk [vmem:[%s333_s16 + $0x8] sm:$0xf] %vm598_vm2, %v596_v13  ;;  %602 = vst.msk [vmem:[%s333_s16 + $0xc] sm:$0xf] %vm598_vm2, %v597_v14 }
 0x313   : > { %762 = vxpose.xlu1.b32.start.end [1/1] (short) (narrow) %v760_v15, 32 }
 0x314   : > { %1244 = shalt.err (!%p1241_p9)
}
 0x315   : > { %s1245_s8 = scalar_lea.hbm %s1646_s18, 256  ;;  %s1249_s11 = scalar_lea.hbm %s1802_s5, 512 }
 0x316   : > { %p1246_p1 = scmp.ne.s32.totalorder %s1646_s18, %s1245_s8  ;;  %p1250_p3 = scmp.lt.u32.totalorder %s1646_s18, %s1802_s5 }
 0x317   : > { %p1251_p4 = scmp.lt.u32.totalorder %s1249_s11, %s1245_s8  ;;  %p1253_p6 = scmp.lt.u32.totalorder %s1245_s8, %s1646_s18 }
 0x318   : > { %p1247_p2 = pnand %p1246_p1, %p1530_p10 }
 0x319   : > { %p1252_p13 = por %p1251_p4, %p1250_p3 }
 0x31a   : > { %p1248_p7 = pneg %p1247_p2 }
 0x31b   : > { %p1254_p8 = por %p1253_p6, %p1252_p13 }
 0x31d   : > { %p1255_p12 = pnand %p1254_p8, %p1248_p7 }
 0x31f   : > { %1258 = shalt.err (!%p1255_p12)
}
 0x320   : > { %s1393_s13 = smov 4   ;;  %v604_v16 = vpop.permute.xlu1 %603  ;;  %s347_s15 = scalar_lea.vmem [#allocation10], %s1632_s20 }
 0x321   : > { %1080 = dma.vmem_to_hbm [thread:$0]  (%p1530_p10), %s1648_s14, 256, %s1646_s18, %s803_s19, %s1389_s12, %s1389_s12, %s1393_s13  }
 0x322   : > { %s340_s18 = scalar_lea.vmem [#allocation8], %s1632_s20  ;;  %s807_s19 = sand.u32 1, %s1467_s30  }
 0x323   : > { %s846_s14 = sshll.u32 %s340_s18, 4  ;;  %s864_s22 = sshll.u32 %s347_s15, 4  ;;  %s1703_s14 = int_to_ptr.vmem [resolvable:$true] %s846_s14  ;;  %s1711_s22 = int_to_ptr.vmem [resolvable:$true] %s864_s22 }
 0x324   : > { %s1709_s16 = scalar_lea.hbm %s1803_s6, %s1640_s3  ;;  %s1717_s30 = scalar_lea.hbm %s1804_s7, %s1640_s3 }
 0x325   : > { %s1720_s27 = scalar_lea.sflag [#allocation9], %s807_s19  ;;  %s1259_s17 = scalar_lea.vmem %s1703_s14, 256 }
 0x326   : > { %p1260_p11 = scmp.ne.s32.totalorder %s1703_s14, %s1259_s17 }
 0x328   : > { %p1261_p0 = pnand %p1260_p11, %p1530_p10 }
 0x32a   : > { %p1262_p5 = pneg %p1261_p0 }
 0x354   : > { %v606_v17 = vpop.permute.xlu1 %605 }
 0x358   : > { %v608_v18 = vpop.permute.xlu1 %607 }
 0x359   : > { %v615_v19 = vcombine.low %v604_v16, %v608_v18  ;;  %v616_v20 = vcombine.high %v604_v16, %v608_v18 }
 0x35b   : > { %v623_v24 = vrot.slane %v615_v19, %v1609_v36  ;;  %v630_v25 = vrot.slane %v616_v20, %v1609_v36 }
 0x35c   : > { %v610_v21 = vpop.permute.xlu1 %609 }
 0x35d   : > { %v631_v22 = vcombine.low %v606_v17, %v610_v21  ;;  %v632_v23 = vcombine.high %v606_v17, %v610_v21 }
 0x35f   : > { %v639_v26 = vrot.slane %v631_v22, %v1609_v36  ;;  %v646_v27 = vrot.slane %v632_v23, %v1609_v36 }
 0x361   : > { %v647_v28 = vcombine.low %v623_v24, %v639_v26  ;;  %v648_v29 = vcombine.high %v623_v24, %v639_v26  ;;  %v663_v30 = vcombine.low %v630_v25, %v646_v27  ;;  %v664_v31 = vcombine.high %v630_v25, %v646_v27 }
 0x363   : > { %v655_v32 = vrot.slane %v647_v28, %v1612_v42  ;;  %v662_v33 = vrot.slane %v648_v29, %v1612_v42  ;;  %v671_v34 = vrot.slane %v663_v30, %v1612_v42  ;;  %v678_v35 = vrot.slane %v664_v31, %v1612_v42 }
 0x365   : > { %v683_v37 = vcombine.low %v655_v32, %v662_v33  ;;  %v1047_v38 = vcombine.high %v655_v32, %v662_v33  ;;  %v699_v39 = vcombine.low %v671_v34, %v678_v35  ;;  %v1048_v40 = vcombine.high %v671_v34, %v678_v35 }
 0x367   : > { %v690_v41 = vrot.slane %v683_v37, %v1609_v36  ;;  %v698_v43 = vrot.slane %v1047_v38, %v1609_v36  ;;  %v706_v44 = vrot.slane %v699_v39, %v1609_v36  ;;  %v714_v45 = vrot.slane %v1048_v40, %v1609_v36 }
 0x369   : > { %v715_v46 = vcombine.low %v690_v41, %v698_v43  ;;  %v716_v47 = vcombine.high %v690_v41, %v698_v43  ;;  %v731_v48 = vcombine.low %v706_v44, %v714_v45  ;;  %v732_v49 = vcombine.high %v706_v44, %v714_v45 }
 0x36b   : > { %v723_v50 = vrot.slane %v715_v46, %v1612_v42  ;;  %v730_v51 = vrot.slane %v716_v47, %v1612_v42  ;;  %v739_v52 = vrot.slane %v731_v48, %v1612_v42  ;;  %v746_v53 = vrot.slane %v732_v49, %v1612_v42 }
 0x36d   : > { %v747_v54 = vcombine.low %v723_v50, %v739_v52  ;;  %v748_v55 = vcombine.high %v723_v50, %v739_v52  ;;  %v749_v56 = vcombine.low %v730_v51, %v746_v53  ;;  %v750_v57 = vcombine.high %v730_v51, %v746_v53 }
 0x36f   : > { %v751_v58 = vpack.c.bf16 %v747_v54, %v747_v54  ;;  %v752_v36 = vpack.c.bf16 %v748_v55, %v748_v55  ;;  %v753_v59 = vpack.c.bf16 %v749_v56, %v749_v56  ;;  %v754_v60 = vpack.c.bf16 %v750_v57, %v750_v57 }
 0x371   : > { %755 = vst.msk [vmem:[%s347_s15] sm:$0xf] %vm598_vm2, %v751_v58  ;;  %756 = vst.msk [vmem:[%s347_s15 + $0x4] sm:$0xf] %vm598_vm2, %v752_v36 }
 0x372   : > { %757 = vst.msk [vmem:[%s347_s15 + $0x8] sm:$0xf] %vm598_vm2, %v753_v59  ;;  %758 = vst.msk [vmem:[%s347_s15 + $0xc] sm:$0xf] %vm598_vm2, %v754_v60  ;;  %s1394_s15 = smov [#allocation8]  }
 0x373   : > { %s1263_s20 = sshll.u32 %s1394_s15, 4  ;;  %s1264_s20 = int_to_ptr.vmem [resolvable:$false] %s1263_s20 }
 0x374   : > { %s1265_s8 = scalar_lea.vmem %s1264_s20, 512  ;;  %p1266_p9 = scmp.lt.s32.totalorder %s1703_s14, %s1264_s20 }
 0x375   : > { %p1267_p1 = scmp.lt.s32.totalorder %s1265_s8, %s1259_s17 }
 0x377   : > { %p1268_p2 = por %p1267_p1, %p1266_p9 }
 0x379   : > { %p1269_p7 = pnand %p1268_p2, %p1262_p5 }
 0x393   : > { %v778_v42 = vpop.trf.xlu1 }
 0x394   : > { %v794_v61 = vpack.c.bf16 %v778_v42, %v778_v42 }
 0x396   : > { %798 = vst.msk [vmem:[%s340_s18] sm:$0xf] %vm598_vm2, %v794_v61 }
 0x397   : > { %v779_v62 = vpop.trf.xlu1 }
 0x398   : > { %v795_v63 = vpack.c.bf16 %v779_v62, %v779_v62 }
 0x39a   : > { %799 = vst.msk [vmem:[%s340_s18 + $0x4] sm:$0xf] %vm598_vm2, %v795_v63 }
 0x39b   : > { %v780_v0 = vpop.trf.xlu1 }
 0x39c   : > { %v796_v1 = vpack.c.bf16 %v780_v0, %v780_v0 }
 0x39e   : > { %800 = vst.msk [vmem:[%s340_s18 + $0x8] sm:$0xf] %vm598_vm2, %v796_v1 }
 0x39f   : > { %v781_v2 = vpop.trf.xlu1 }
 0x3a0   : > { %v797_v3 = vpack.c.bf16 %v781_v2, %v781_v2 }
 0x3a2   : > { %801 = vst.msk [vmem:[%s340_s18 + $0xc] sm:$0xf] %vm598_vm2, %v797_v3 }
 0x3a3   : > { %1272 = shalt.err (!%p1269_p7)
}
 0x3a4   : > { %s1273_s3 = scalar_lea.hbm %s1709_s16, 256  ;;  %s1277_s9 = scalar_lea.hbm %s1803_s6, 512 }
 0x3a5   : > { %p1274_p3 = scmp.ne.s32.totalorder %s1709_s16, %s1273_s3  ;;  %p1278_p6 = scmp.lt.u32.totalorder %s1709_s16, %s1803_s6 }
 0x3a6   : > { %p1279_p8 = scmp.lt.u32.totalorder %s1277_s9, %s1273_s3  ;;  %p1281_p11 = scmp.lt.u32.totalorder %s1273_s3, %s1709_s16 }
 0x3a7   : > { %p1275_p4 = pnand %p1274_p3, %p1530_p10 }
 0x3a8   : > { %p1280_p12 = por %p1279_p8, %p1278_p6 }
 0x3a9   : > { %p1276_p13 = pneg %p1275_p4 }
 0x3aa   : > { %p1282_p0 = por %p1281_p11, %p1280_p12 }
 0x3ac   : > { %p1283_p5 = pnand %p1282_p0, %p1276_p13 }
 0x3ae   : > { %1286 = shalt.err (!%p1283_p5)
}
 0x3af   : > { %1081 = dma.vmem_to_hbm [thread:$0]  (%p1530_p10), %s1703_s14, 256, %s1709_s16, %s1720_s27, %s1389_s12, %s1389_s12, %s1393_s13  }
 0x3b0   : > { %s1287_s17 = scalar_lea.vmem %s1711_s22, 256  ;;  %s1395_s20 = smov [#allocation10]  }
 0x3b1   : > { %p1288_p9 = scmp.ne.s32.totalorder %s1711_s22, %s1287_s17  ;;  %s1291_s8 = sshll.u32 %s1395_s20, 4  ;;  %s1292_s8 = int_to_ptr.vmem [resolvable:$false] %s1291_s8 }
 0x3b2   : > { %s1293_s3 = scalar_lea.vmem %s1292_s8, 512  ;;  %p1294_p7 = scmp.lt.s32.totalorder %s1711_s22, %s1292_s8 }
 0x3b3   : > { %p1289_p1 = pnand %p1288_p9, %p1530_p10  ;;  %p1295_p3 = scmp.lt.s32.totalorder %s1293_s3, %s1287_s17 }
 0x3b5   : > { %p1290_p2 = pneg %p1289_p1  ;;  %p1296_p4 = por %p1295_p3, %p1294_p7 }
 0x3b7   : > { %p1297_p13 = pnand %p1296_p4, %p1290_p2 }
 0x3b9   : > { %1300 = shalt.err (!%p1297_p13)
}
 0x3ba   : > { %s1301_s14 = scalar_lea.hbm %s1717_s30, 256  ;;  %s1305_s19 = scalar_lea.hbm %s1804_s7, 512 }
 0x3bb   : > { %p1302_p6 = scmp.ne.s32.totalorder %s1717_s30, %s1301_s14  ;;  %p1306_p11 = scmp.lt.u32.totalorder %s1717_s30, %s1804_s7 }
 0x3bc   : > { %p1307_p0 = scmp.lt.u32.totalorder %s1305_s19, %s1301_s14  ;;  %p1309_p9 = scmp.lt.u32.totalorder %s1301_s14, %s1717_s30 }
 0x3bd   : > { %p1303_p8 = pnand %p1302_p6, %p1530_p10 }
 0x3be   : > { %p1308_p5 = por %p1307_p0, %p1306_p11 }
 0x3bf   : > { %p1304_p12 = pneg %p1303_p8 }
 0x3c0   : > { %p1310_p1 = por %p1309_p9, %p1308_p5 }
 0x3c2   : > { %p1311_p2 = pnand %p1310_p1, %p1304_p12 }
 0x3c4   : > { %1314 = shalt.err (!%p1311_p2)
}
 0x3c5   : > { %1082 = dma.vmem_to_hbm [thread:$0]  (%p1530_p10), %s1711_s22, 256, %s1717_s30, %s1720_s27, %s1389_s12, %s1389_s12, %s1393_s13  }
 0x3c6 PF: > { %s879_s15 = sand.u32 1, %s1357_s24   ;;  %p1825_p7 = scmp.ne.s32.totalorder %s1812_s10, 0 }
 0x3c7   : > { %p1826_p3 = scmp.ge.s32.totalorder %s1377_s29, 2  ;;  %s880_s17 = scalar_lea.sflag [#allocation4], %s879_s15 }
 0x3c9   : > { %p1095_p4 = pnand %p1826_p3, %p1825_p7 }
 0x3cb   : > { %1348 = dma.done.wait (!%p1095_p4), %s880_s17, 256  }
 0x3cc   : > { %1350 = vsyncadd (!%p1095_p4), %s880_s17, 4294967040  ;;  %s1827_s21 = sadd.s32 4294967294, %s1377_s29  }
 0x3cd   : > { %s888_s20 = sand.u32 1, %s1827_s21  }
 0x3ce   : > { %s889_s8 = scalar_lea.sflag [#allocation9], %s888_s20 }
 0x3cf   : > { %1352 = dma.done.wait (!%p1095_p4), %s889_s8, 512  }
 0x3d0   : > { %1354 = vsyncadd (!%p1095_p4), %s889_s8, 4294966784  ;;  %s28_s29 = sadd.s32 1, %s1377_s29   ;;  %s1828_s12 = sld [smem:[#allocation15_spill]] }
 0x3d1   : > { %p25_p10 = scmp.ge.s32.totalorder %s28_s29, 4   ;;  %s1829_s24 = smov %s1361_s25 }
 0x3d2   : > { %s1830_s25 = smov %s1365_s26  ;;  %s1831_s26 = smov %s1539_s23 }
 0x3d3   : > { %s1832_s27 = smov %s1373_s28  ;;  %27 = sbr.rel (!%p25_p10) target bundleno = 11 (0xb), region = 121 }
 0x3d6   : > { %s1833_s28 = smov %s1828_s12 }
 0x3da   :  { %903 = vsyncpa [#allocation3], 1 }
 0x3db   :  { %905 = vsyncpa [#allocation3 + $0x1], 1 }
 0x3dc   :  { %906 = vsyncpa [#allocation6], 1 }
 0x3dd   :  { %907 = vsyncpa [#allocation4], 1 }
 0x3de   :  { %909 = vsyncpa [#allocation4 + $0x1], 1 }
 0x3df   :  { %910 = vsyncpa [#allocation9], 1 }
 0x3e0   :  { %912 = vsyncpa [#allocation9 + $0x1], 1 }

</bundles_post_ra>
